<compile_context>
chip_gen: v7x
topology: tpu7x:2x2x1
jax: 0.10.0
libtpu: 0.0.40
codegen_flags: <defaults>
</compile_context>

<pallas_src>
import functools
import math

import jax
import jax.numpy as jnp
from jax.experimental import pallas as pl
from jax.experimental.pallas import tpu as pltpu


def _round_up(x: int, m: int) -> int:
    return (x + m - 1) // m * m


# ---------------------------------------------------------------------------
# Fused TimeEmbedder kernel: sinusoidal embedding -> standardize -> MLP
# ---------------------------------------------------------------------------
def _time_embedder_kernel(t_ref, w1_ref, b1_ref, w2_ref, b2_ref, o_ref, *,
                          dim, time_scaling, max_positions):
    half = dim // 2
    t = t_ref[...]                                           # (TN, 1) f32

    # EDM freqs computed in-kernel (review: drop the freqs input + its DMA).
    # freqs[k] = (1/max_positions) ** (2k/dim) = exp(-2*ln(max_positions)*k/dim)
    col = jax.lax.broadcasted_iota(jnp.int32, (1, dim), 1)   # 0 .. dim-1
    k = jnp.where(col < half, col, col - half).astype(jnp.float32)
    freqs = jnp.exp(k * jnp.float32(-2.0 * math.log(max_positions) / dim))

    # outer(t * time_scaling, freqs); cat([cos, sin], dim=1) is built as one
    # lane-dense (TN, dim) tensor (no sub-128-lane masked stores / concat).
    phase = (t * jnp.float32(time_scaling)) * freqs          # (TN, dim)
    emb = jnp.where(col < half, jnp.cos(phase), jnp.sin(phase))

    # standardize: (x - mean) / std   (torch.std default => unbiased, /(dim-1))
    mean = jnp.mean(emb, axis=-1, keepdims=True)
    centered = emb - mean
    var = jnp.sum(centered * centered, axis=-1, keepdims=True) / (dim - 1)
    normed = centered * jax.lax.rsqrt(var)

    # map_time: Linear -> SiLU -> Linear (MXU, f32 accumulation)
    h = jnp.dot(normed, w1_ref[...], preferred_element_type=jnp.float32) + b1_ref[...]
    h = h * jax.nn.sigmoid(h)                                # SiLU
    out = jnp.dot(h, w2_ref[...], preferred_element_type=jnp.float32) + b2_ref[...]
    o_ref[...] = out.astype(o_ref.dtype)


def time_embedder(t, w1, b1, w2, b2, *, time_scaling=1000.0,
                  max_positions=10000, tile_n=None):
    """t: (N,) timesteps. w1: (dim, hidden), w2: (hidden, hidden) (already
    transposed vs. torch Linear). Returns (N, hidden) float32."""
    n = t.shape[0]
    dim, hidden = w1.shape
    if tile_n is None:
        # multiple of 8; grows with N (up to 512-row tiles) to amortize the
        # ~0.35us/step overhead while staying far under v7x's 32 MiB scoped VMEM.
        tile_n = max(8, min(512, _round_up(n, 8)))
    n_pad = _round_up(n, tile_n)
    t2 = jnp.pad(t.astype(jnp.float32), (0, n_pad - n)).reshape(n_pad, 1)

    kernel = functools.partial(_time_embedder_kernel, dim=dim,
                               time_scaling=float(time_scaling),
                               max_positions=float(max_positions))
    out = pl.pallas_call(
        kernel,
        out_shape=jax.ShapeDtypeStruct((n_pad, hidden), jnp.float32),
        grid_spec=pltpu.PrefetchScalarGridSpec(
            num_scalar_prefetch=0,
            grid=(n_pad // tile_n,),
            in_specs=[
                pl.BlockSpec((tile_n, 1), lambda i: (i, 0)),       # t   (streamed)
                pl.BlockSpec((dim, hidden), lambda i: (0, 0)),     # w1  (resident)
                pl.BlockSpec((1, hidden), lambda i: (0, 0)),       # b1
                pl.BlockSpec((hidden, hidden), lambda i: (0, 0)),  # w2
                pl.BlockSpec((1, hidden), lambda i: (0, 0)),       # b2
            ],
            out_specs=pl.BlockSpec((tile_n, hidden), lambda i: (i, 0)),
        ),
        compiler_params=pltpu.CompilerParams(
            dimension_semantics=("parallel",)),  # shard N-tiles across v7x's 2 TCs
    )(t2, w1.astype(jnp.float32), b1.reshape(1, hidden).astype(jnp.float32),
      w2.astype(jnp.float32), b2.reshape(1, hidden).astype(jnp.float32))
    return out[:n]


# ---------------------------------------------------------------------------
# input_projection: Linear(num_feats, latent_dim) + PositionalEncoding add
# ---------------------------------------------------------------------------
def _input_projection_kernel(x_ref, w_ref, b_ref, pe_ref, o_ref):
    xb = x_ref[0]                                                  # (S, F)
    h = jnp.dot(xb, w_ref[...], preferred_element_type=jnp.float32)
    h = h + b_ref[...] + pe_ref[...]                               # bias + PE table
    o_ref[0] = h.astype(o_ref.dtype)                               # one dense store


def input_projection(x, w, b, pe):
    """x: (B, S, F), w: (F, D), b: (D,), pe: (S, D). Returns (B, S, D) f32."""
    B, S, F = x.shape
    D = w.shape[1]
    return pl.pallas_call(
        _input_projection_kernel,
        out_shape=jax.ShapeDtypeStruct((B, S, D), jnp.float32),
        grid_spec=pltpu.PrefetchScalarGridSpec(
            num_scalar_prefetch=0,
            grid=(B,),
            in_specs=[
                pl.BlockSpec((1, S, F), lambda i: (i, 0, 0)),  # x   (streamed per batch)
                pl.BlockSpec((F, D), lambda i: (0, 0)),        # W   (resident)
                pl.BlockSpec((1, D), lambda i: (0, 0)),        # b
                pl.BlockSpec((S, D), lambda i: (0, 0)),        # PE table
            ],
            out_specs=pl.BlockSpec((1, S, D), lambda i: (i, 0, 0)),
        ),
        compiler_params=pltpu.CompilerParams(dimension_semantics=("parallel",)),
    )(x.astype(jnp.float32), w.astype(jnp.float32),
      b.reshape(1, D).astype(jnp.float32), pe.astype(jnp.float32))


def make_positional_encoding_table(seq_len, d_model, base=10000.0):
    # Mirrors PositionalEncoding.__init__ (pe[:, 0::2]=sin, pe[:, 1::2]=cos).
    pos = jnp.arange(seq_len, dtype=jnp.float32)[:, None]
    div = jnp.exp(jnp.arange(0, d_model, 2, dtype=jnp.float32)
                  * (-math.log(base) / d_model))
    ang = pos * div                                              # (S, D//2)
    return jnp.stack([jnp.sin(ang), jnp.cos(ang)], axis=-1).reshape(seq_len, d_model)


# ---------------------------------------------------------------------------
# Pure-JAX references (mirror the PyTorch forward)
# ---------------------------------------------------------------------------
def time_embedder_ref(t, w1, b1, w2, b2, *, time_scaling=1000.0, max_positions=10000):
    dim = w1.shape[0]
    half = dim // 2
    freqs = jnp.exp(jnp.arange(half, dtype=jnp.float32)
                    * (-2.0 * math.log(max_positions) / dim))
    phase = jnp.outer(t.astype(jnp.float32) * time_scaling, freqs)
    emb = jnp.concatenate([jnp.cos(phase), jnp.sin(phase)], axis=1)
    mean = emb.mean(axis=-1, keepdims=True)
    var = jnp.sum((emb - mean) ** 2, axis=-1, keepdims=True) / (dim - 1)
    emb = (emb - mean) / jnp.sqrt(var)
    h = emb @ w1 + b1
    h = h * jax.nn.sigmoid(h)
    return h @ w2 + b2


def input_projection_ref(x, w, b, pe):
    return x.astype(jnp.float32) @ w + b + pe[None]


if __name__ == "__main__":
    key = jax.random.PRNGKey(0)
    B, S, F, D = 2, 8, 16, 32          # batch, frames, num_feats, latent_dim
    time_dim = D // 4                  # 8   (TimeEmbedder dim = latent_dim // 4)
    hidden = time_dim * 4              # 32  (expansion = 4)

    ks = jax.random.split(key, 8)
    x = jax.random.normal(ks[0], (B, S, F), jnp.float32)
    timesteps = jax.random.uniform(ks[1], (B,), jnp.float32)     # diffusion t in [0,1)
    w_in = jax.random.normal(ks[2], (F, D), jnp.float32) * 0.05
    b_in = jax.random.normal(ks[3], (D,), jnp.float32) * 0.05
    w1 = jax.random.normal(ks[4], (time_dim, hidden), jnp.float32) * 0.05
    b1 = jax.random.normal(ks[5], (hidden,), jnp.float32) * 0.05
    w2 = jax.random.normal(ks[6], (hidden, hidden), jnp.float32) * 0.05
    b2 = jax.random.normal(ks[7], (hidden,), jnp.float32) * 0.05
    pe = make_positional_encoding_table(S, D)

    x_proj = input_projection(x, w_in, b_in, pe)
    t_emb = time_embedder(timesteps, w1, b1, w2, b2, time_scaling=1000.0)
    jax.block_until_ready((x_proj, t_emb))

    x_proj_ref = input_projection_ref(x, w_in, b_in, pe)
    t_emb_ref = time_embedder_ref(timesteps, w1, b1, w2, b2, time_scaling=1000.0)

    assert x_proj.shape == (B, S, D) and x_proj.dtype == jnp.float32
    assert t_emb.shape == (B, hidden) and t_emb.dtype == jnp.float32
    assert bool(jnp.allclose(x_proj, x_proj_ref, atol=1e-4, rtol=1e-4))
    assert bool(jnp.allclose(t_emb, t_emb_ref, atol=1e-4, rtol=1e-4))

    print("KERNEL_OK")
</pallas_src>

<mosaic_0001>
module attributes {stable_mosaic.version = 11 : i64} {
  func.func @_input_projection_kernel(%arg0: i32, %arg1: memref<1x8x16xf32, #tpu.memory_space<vmem>>, %arg2: memref<16x32xf32, #tpu.memory_space<vmem>>, %arg3: memref<1x32xf32, #tpu.memory_space<vmem>>, %arg4: memref<8x32xf32, #tpu.memory_space<vmem>>, %arg5: memref<1x8x32xf32, #tpu.memory_space<vmem>>) attributes {dimension_semantics = [#tpu.dimension_semantics<parallel>], iteration_bounds = array<i64: 2>, scalar_prefetch = 0 : i64, scratch_operands = 0 : i64, tpu.core_type = #tpu.core_type<tc>, window_params = [{transform_indices = @transform_0, window_bounds = array<i64: 1, 8, 16>}, {pipeline_mode = #tpu.pipeline_mode<synchronous>, transform_indices = @transform_1, window_bounds = array<i64: 16, 32>}, {pipeline_mode = #tpu.pipeline_mode<synchronous>, transform_indices = @transform_2, window_bounds = array<i64: 1, 32>}, {pipeline_mode = #tpu.pipeline_mode<synchronous>, transform_indices = @transform_3, window_bounds = array<i64: 8, 32>}, {transform_indices = @transform_4, window_bounds = array<i64: 1, 8, 32>}]} {
    %c0 = arith.constant 0 : index
    %c0_0 = arith.constant 0 : index
    %c0_1 = arith.constant 0 : index
    %0 = vector.load %arg1[%c0, %c0_0, %c0_1] : memref<1x8x16xf32, #tpu.memory_space<vmem>>, vector<1x8x16xf32>
    %1 = vector.shape_cast %0 : vector<1x8x16xf32> to vector<8x16xf32>
    %c0_2 = arith.constant 0 : index
    %c0_3 = arith.constant 0 : index
    %2 = vector.load %arg2[%c0_2, %c0_3] : memref<16x32xf32, #tpu.memory_space<vmem>>, vector<16x32xf32>
    %cst = arith.constant dense<0.000000e+00> : vector<8x32xf32>
    %3 = tpu.matmul %1, %2, %cst {dimension_numbers = #tpu.dot_dimension_numbers<[1], [0], [0], [1], [0, 0, 1, 1], [], []>} : vector<8x16xf32>, vector<16x32xf32>, vector<8x32xf32> -> vector<8x32xf32>
    %c0_4 = arith.constant 0 : index
    %c0_5 = arith.constant 0 : index
    %4 = vector.load %arg3[%c0_4, %c0_5] : memref<1x32xf32, #tpu.memory_space<vmem>>, vector<1x32xf32>
    %5 = vector.broadcast %4 : vector<1x32xf32> to vector<8x32xf32>
    %6 = arith.addf %3, %5 : vector<8x32xf32>
    %c0_6 = arith.constant 0 : index
    %c0_7 = arith.constant 0 : index
    %7 = vector.load %arg4[%c0_6, %c0_7] : memref<8x32xf32, #tpu.memory_space<vmem>>, vector<8x32xf32>
    %8 = arith.addf %6, %7 : vector<8x32xf32>
    %c0_8 = arith.constant 0 : index
    %c0_9 = arith.constant 0 : index
    %c0_10 = arith.constant 0 : index
    %9 = vector.load %arg5[%c0_8, %c0_9, %c0_10] : memref<1x8x32xf32, #tpu.memory_space<vmem>>, vector<1x8x32xf32>
    %10 = vector.shape_cast %9 : vector<1x8x32xf32> to vector<8x32xf32>
    %11 = vector.shape_cast %8 : vector<8x32xf32> to vector<1x8x32xf32>
    tpu.vector_store %arg5[%c0_8, %c0_9, %c0_10], %11 {strides = array<i32>} : memref<1x8x32xf32, #tpu.memory_space<vmem>>, vector<1x8x32xf32>,
    return
  }
  func.func @transform_0(%arg0: i32) -> (i32, i32, i32) {
    %c0_i32 = arith.constant 0 : i32
    %c0_i32_0 = arith.constant 0 : i32
    %c0_i32_1 = arith.constant 0 : i32
    return %arg0, %c0_i32, %c0_i32_0 : i32, i32, i32
  }
  func.func @transform_1(%arg0: i32) -> (i32, i32) {
    %c0_i32 = arith.constant 0 : i32
    %c0_i32_0 = arith.constant 0 : i32
    %c0_i32_1 = arith.constant 0 : i32
    return %c0_i32, %c0_i32_0 : i32, i32
  }
  func.func @transform_2(%arg0: i32) -> (i32, i32) {
    %c0_i32 = arith.constant 0 : i32
    %c0_i32_0 = arith.constant 0 : i32
    %c0_i32_1 = arith.constant 0 : i32
    return %c0_i32, %c0_i32_0 : i32, i32
  }
  func.func @transform_3(%arg0: i32) -> (i32, i32) {
    %c0_i32 = arith.constant 0 : i32
    %c0_i32_0 = arith.constant 0 : i32
    %c0_i32_1 = arith.constant 0 : i32
    return %c0_i32, %c0_i32_0 : i32, i32
  }
  func.func @transform_4(%arg0: i32) -> (i32, i32, i32) {
    %c0_i32 = arith.constant 0 : i32
    %c0_i32_0 = arith.constant 0 : i32
    %c0_i32_1 = arith.constant 0 : i32
    return %arg0, %c0_i32, %c0_i32_0 : i32, i32, i32
  }
}

</mosaic_0001>

<bundles_post_ra>
// kernel: tpu_custom_call.1
= control target key start
LH: loop header
LB: loop body
LE: loop exit
PB: predicated region body
PF: predicated region fallthrough
CT: control target
= control target key end

     0   :  { %9 = vsyncpa [#allocation3], 0  ;;  %s866_s0 = inlined_call_operand.hbm [shape: f32[2,8,16], index: 0, kind: input, shape index: {}]   ;;  %s867_s1 = inlined_call_operand.hbm [shape: f32[16,32], index: 1, kind: input, shape index: {}]   ;;  %s868_s2 = inlined_call_operand.vmem [shape: f32[1,32], index: 2, kind: input, shape index: {}]   ;;  %s869_s3 = inlined_call_operand.vmem [shape: f32[8,32], index: 3, kind: input, shape index: {}]   ;;  %s870_s4 = inlined_call_operand.hbm [shape: f32[2,8,32], index: 4, kind: output, shape index: {}]  }
   0x1   :  { %11 = vsyncpa [#allocation3 + $0x1], 0 }
   0x2   :  { %12 = vsyncpa [#allocation6], 0 }
   0x3   :  { %13 = vsyncpa [#allocation4], 0 }
   0x4   :  { %15 = vsyncpa [#allocation4 + $0x1], 0  ;;  %s664_s15 = smov 0   ;;  %s666_s16 = smov 0  }
   0x5   :  { %s668_s17 = smov 0   ;;  %s670_s18 = smov 0  }
   0x6 LB: > { %s685_s19 = sadd.s32 4294967295, %s629_s18   ;;  %s410_s20 = sadd.s32 4294967294, %s629_s18   ;;  %s629_s18 = sphi %s670_s18, %s890_s18   ;;  %s625_s17 = sphi %s668_s17, %s889_s17   ;;  %s621_s16 = sphi %s666_s16, %s888_s16   ;;  %s617_s15 = sphi %s664_s15, %s887_s15  }
   0x7   : > { %p41_p0 = scmp.ne.s32.totalorder %s621_s16, %s617_s15  ;;  %p871_p1 = scmp.eq.s32.totalorder %s685_s19, 0 }
   0x8   : > { %p134_p3 = scmp.eq.s32.totalorder %s410_s20, 1  ;;  %p411_p5 = scmp.ge.s32.totalorder %s629_s18, 1 }
   0x9   : > { %p694_p4 = por %p871_p1, %p41_p0  ;;  %p141_p7 = scmp.lt.s32.totalorder %s629_s18, 3 }
   0xa   : > { %p699_p6 = por %p134_p3, %p41_p0  ;;  %s631_s24 = smov [#allocation5]  }
   0xb   : > { %s874_s21 = scalar_select %p694_p4, 1, 0 }
   0xc   : > { %s875_s22 = scalar_select %p699_p6, 1, 0 }
   0xd   : > { %p704_p8 = pnand %p411_p5, %p141_p7  ;;  %s153_s25 = sshll.u32 %s631_s24, 4  ;;  %s708_s25 = int_to_ptr.vmem [resolvable:$true] %s153_s25 }
   0xe   : > { %s720_s27 = sadd.s32 1, %s629_s18   ;;  %s28_s28 = sadd.s32 1, %s625_s17 }
   0xf   : > { %s876_s23 = scalar_select %p704_p8, 1, 0 }
  0x10   : > { %p447_p9 = pneg %p704_p8  ;;  %s25_s29 = ssub.s32 %s629_s18, %s720_s27 }
  0x11   : > { %s501_s6 = scalar_lea.hbm %s867_s1, 256 }
  0x12   : > { %p715_p11 = pnand %p447_p9, %p871_p1  ;;  %p502_p12 = scmp.ne.s32.totalorder %s867_s1, %s501_s6 }
  0x13   : > { %p508_p5 = scmp.lt.u32.totalorder %s501_s6, %s867_s1 }
  0x14   : > { %p503_p13 = pneg %p715_p11 }
  0x16   : > { %p504_p0 = pnand %p503_p13, %p502_p12 }
  0x18   : > { %p505_p3 = pneg %p504_p0 }
  0x1a   : > { %p510_p7 = pnand %p508_p5, %p505_p3 }
  0x1c   : > { %513 = shalt.err (!%p510_p7)
}
  0x1d   : > { %s514_s11 = scalar_lea.vmem %s708_s25, 256  ;;  %p522_p2 = scmp.lt.s32.totalorder %s708_s25, %s708_s25 }
  0x1e   : > { %p515_p9 = scmp.ne.s32.totalorder %s708_s25, %s514_s11  ;;  %p523_p6 = scmp.lt.s32.totalorder %s514_s11, %s514_s11 }
  0x20   : > { %p517_p10 = pnand %p515_p9, %p503_p13  ;;  %p524_p4 = por %p523_p6, %p522_p2 }
  0x22   : > { %p518_p1 = pneg %p517_p10 }
  0x24   : > { %p525_p8 = pnand %p524_p4, %p518_p1 }
  0x26   : > { %528 = shalt.err (!%p525_p8)
}
  0x27   : > { %s632_s12 = smov 128   ;;  %s633_s13 = smov 8  }
  0x28   : > { %450 = dma.hbm_to_vmem [thread:$0]  (!%p715_p11), %s867_s1, 256, %s708_s25, [#allocation6], %s632_s12, %s632_s12, %s633_s13  }
  0x29   : > { %p26_p2 = scmp.eq.s32.totalorder %s25_s29, 0  ;;  %p35_p1 = scmp.ne.s32.totalorder %s625_s17, %s621_s16 }
  0x2a   : > { %p36_p4 = scmp.eq.s32.totalorder %s629_s18, 0  ;;  %p460_p6 = scmp.lt.s32.totalorder %s629_s18, 2 }
  0x2b   : > { %s751_s24 = scalar_select %p26_p2, %s625_s17, %s28_s28  }
  0x2c   : > { %p37_p8 = por %p36_p4, %p35_p1  ;;  %p878_p10 = scmp.eq.s32.totalorder %s685_s19, 1 }
  0x2d   : > { %s173_s5 = sand.u32 1, %s625_s17   ;;  %s415_s6 = sshll.u32 %s629_s18, 7 }
  0x2e   : > { %p755_p12 = por %p878_p10, %p35_p1  ;;  %s414_s7 = sshll.u32 %s173_s5, 3 }
  0x2f   : > { %s764_s9 = scalar_lea.hbm %s866_s0, %s415_s6  ;;  %s177_s25 = scalar_lea.vmem [#allocation2], %s414_s7 }
  0x30   : > { %s184_s28 = sshll.u32 %s177_s25, 4  ;;  %p766_p11 = pnand %p460_p6, %p37_p8  ;;  %s770_s28 = int_to_ptr.vmem [resolvable:$true] %s184_s28 }
  0x31   : > { %s174_s10 = scalar_lea.sflag [#allocation3], %s173_s5  ;;  %s529_s11 = scalar_lea.hbm %s764_s9, 128 }
  0x32   : > { %p530_p13 = scmp.ne.s32.totalorder %s764_s9, %s529_s11  ;;  %p531_p0 = pneg %p766_p11 }
  0x33   : > { %s534_s14 = scalar_lea.hbm %s866_s0, 256  ;;  %p535_p7 = scmp.lt.u32.totalorder %s764_s9, %s866_s0 }
  0x34   : > { %p532_p3 = pnand %p531_p0, %p530_p13  ;;  %p536_p9 = scmp.lt.u32.totalorder %s534_s14, %s529_s11 }
  0x35   : > { %p538_p1 = scmp.lt.u32.totalorder %s529_s11, %s764_s9 }
  0x36   : > { %p533_p5 = pneg %p532_p3  ;;  %p537_p2 = por %p536_p9, %p535_p7 }
  0x38   : > { %p539_p4 = por %p538_p1, %p537_p2 }
  0x3a   : > { %p540_p6 = pnand %p539_p4, %p533_p5 }
  0x3c   : > { %543 = shalt.err (!%p540_p6)
}
  0x3d   : > { %s544_s5 = scalar_lea.vmem %s770_s28, 128  ;;  %s634_s7 = smov [#allocation2]  }
  0x3e   : > { %p545_p8 = scmp.ne.s32.totalorder %s770_s28, %s544_s5  ;;  %s549_s26 = sshll.u32 %s634_s7, 4  ;;  %s550_s26 = int_to_ptr.vmem [resolvable:$false] %s549_s26 }
  0x3f   : > { %s551_s8 = scalar_lea.vmem %s550_s26, 256  ;;  %p552_p3 = scmp.lt.s32.totalorder %s770_s28, %s550_s26 }
  0x40   : > { %p547_p10 = pnand %p545_p8, %p531_p0  ;;  %p553_p7 = scmp.lt.s32.totalorder %s551_s8, %s544_s5 }
  0x42   : > { %p548_p13 = pneg %p547_p10  ;;  %p554_p9 = por %p553_p7, %p552_p3 }
  0x44   : > { %p555_p2 = pnand %p554_p9, %p548_p13 }
  0x46   : > { %558 = shalt.err (!%p555_p2)
}
  0x47   : > { %454 = dma.hbm_to_vmem [thread:$0]  (!%p766_p11), %s764_s9, 128, %s770_s28, %s174_s10  }
  0x48   : > { %p881_p5 = scmp.ne.s32.totalorder %s876_s23, 0 }
  0x49   : > { %s800_s25 = sand.u32 (!%p881_p5), 1, %s621_s16   ;;  %p882_p0 = scmp.ne.s32.totalorder (!%p881_p5), %s874_s21, 0 }
  0x4a   : > { %193 = sbr.rel (%p881_p5) target bundleno = 321 (0x141), region = 36  ;;  %s417_s11 = sshll.u32 (!%p881_p5), %s800_s25, 3 }
  0x4b   : > { %s196_s12 = scalar_lea.sflag (!%p881_p5), [#allocation3], %s800_s25  ;;  %s199_s13 = scalar_lea.vmem (!%p881_p5), [#allocation2], %s417_s11 }
  0x51   : > { %604 = dma.done.wait (%p882_p0), %s196_s12, 128  }
  0x52   : > { %606 = vsyncadd (%p882_p0), %s196_s12, 4294967168  ;;  %p883_p1 = scmp.eq.s32.totalorder %s685_s19, 0 }
  0x54   : > { %608 = dma.done.wait (%p883_p1), [#allocation6], 256   ;;  %p884_p11 = pmov %p883_p1 }
  0x55   : > { %v635_v0 = vmov 0.0|0.0   ;;  %vm636_vm0 = vmmov 0   ;;  %v637_v1 = vmov 0.0   ;;  %v229_v2 = vld [vmem:[#allocation5] sm:$0xff]  ;;  %v230_v3 = vld [vmem:[#allocation5 + $0x8] sm:$0xff]  ;;  %v228_v5 = vld [vmem:[%s199_s13] sm:$0xff] }
  0x56   : > { %610 = vsyncadd (%p884_p11), [#allocation6], 4294967040  ;;  %436 = vmatprep.subr.bf16.mxu0 %v635_v0  ;;  %433 = vmatprep.mubr.msk.f32.mxu0 %vm636_vm0, %v637_v1  ;;  %v437_v4 = vpack.c.bf16 %v230_v3, %v229_v2  ;;  %vm238_vm1 = vcmask 130048   ;;  %v420_v6 = vld [vmem:[%s868_s2] ss:$0 sm:$0xff]  ;;  %s423_s29 = sshll.u32 %s685_s19, 7 }
  0x57   : > { %v312_v8 = vld [vmem:[%s869_s3] sm:$0xff]  ;;  %s227_s10 = scalar_lea.vmem [#allocation7], %s417_s11  ;;  %vm314_vm2 = vcmask 261120   ;;  %s822_s5 = scalar_lea.hbm %s870_s4, %s423_s29 }
  0x58   : > { %438 = vmatpush3.bf16.msra.mxu0 %v437_v4  ;;  %s330_s14 = sshll.u32 %s227_s10, 4  ;;  %s317_s7 = scalar_lea.sflag [#allocation4], %s800_s25  ;;  %s824_s14 = int_to_ptr.vmem [resolvable:$true] %s330_s14 }
  0x59   : > { %s559_s26 = scalar_lea.vmem %s824_s14, 128  ;;  %s638_s19 = smov [#allocation7]  }
  0x5a   : > { %p560_p4 = scmp.ne.s32.totalorder %s824_s14, %s559_s26  ;;  %s563_s8 = sshll.u32 %s638_s19, 4  ;;  %s564_s8 = int_to_ptr.vmem [resolvable:$false] %s563_s8 }
  0x5b   : > { %434 = vmatmul.mubr.msk.f32.vlgmr.msra.gmra.mrb[0].mxu0 %vm238_vm1, %v228_v5  ;;  %s565_s11 = scalar_lea.vmem %s564_s8, 256  ;;  %p566_p10 = scmp.lt.s32.totalorder %s824_s14, %s564_s8 }
  0x5c   : > { %p561_p6 = pnand %p560_p4, %p755_p12  ;;  %p567_p13 = scmp.lt.s32.totalorder %s565_s11, %s559_s26 }
  0x5e   : > { %p562_p8 = pneg %p561_p6  ;;  %p568_p3 = por %p567_p13, %p566_p10 }
  0x60   : > { %p569_p7 = pnand %p568_p3, %p562_p8 }
 0x12e   : > { %v308_v7 = vpop.f32.mrb[0].mxu0 }
 0x12f   : > { %v309_v9 = vadd.f32 %v420_v6, %v308_v7  ;;  %v435_v10 = vpop.f32.mrb[1].mxu0 }
 0x131   : > { %v313_v11 = vadd.f32 %v312_v8, %v309_v9 }
 0x133   : > { %315 = vst.msk [vmem:[%s227_s10] sm:$0xff] %vm314_vm2, %v313_v11 }
 0x134   : > { %572 = shalt.err (!%p569_p7)
}
 0x135   : > { %s573_s25 = scalar_lea.hbm %s822_s5, 128  ;;  %s577_s21 = scalar_lea.hbm %s870_s4, 256 }
 0x136   : > { %p574_p9 = scmp.ne.s32.totalorder %s822_s5, %s573_s25  ;;  %p578_p0 = scmp.lt.u32.totalorder %s822_s5, %s870_s4 }
 0x137   : > { %p579_p1 = scmp.lt.u32.totalorder %s577_s21, %s573_s25  ;;  %p581_p4 = scmp.lt.u32.totalorder %s573_s25, %s822_s5 }
 0x138   : > { %p575_p2 = pnand %p574_p9, %p755_p12 }
 0x139   : > { %p580_p11 = por %p579_p1, %p578_p0 }
 0x13a   : > { %p576_p5 = pneg %p575_p2 }
 0x13b   : > { %p582_p6 = por %p581_p4, %p580_p11 }
 0x13d   : > { %p583_p8 = pnand %p582_p6, %p576_p5 }
 0x13f   : > { %586 = shalt.err (!%p583_p8)
}
 0x140   : > { %445 = dma.vmem_to_hbm [thread:$0]  (%p755_p12), %s824_s14, 128, %s822_s5, %s317_s7  }
 0x141 PF: > { %s342_s28 = sand.u32 1, %s617_s15   ;;  %p885_p10 = scmp.ne.s32.totalorder %s875_s22, 0 }
 0x142   : > { %p886_p13 = scmp.ge.s32.totalorder %s629_s18, 2  ;;  %s343_s29 = scalar_lea.sflag [#allocation4], %s342_s28 }
 0x144   : > { %p456_p3 = pnand %p886_p13, %p885_p10 }
 0x146   : > { %612 = dma.done.wait (!%p456_p3), %s343_s29, 128  }
 0x147   : > { %614 = vsyncadd (!%p456_p3), %s343_s29, 4294967168  ;;  %p18_p7 = scmp.ge.s32.totalorder %s720_s27, 4   ;;  %s887_s15 = smov %s621_s16 }
 0x148   : > { %s888_s16 = smov %s625_s17  ;;  %s889_s17 = smov %s751_s24 }
 0x149   : > { %s890_s18 = smov %s720_s27  ;;  %20 = sbr.rel (!%p18_p7) target bundleno = 6 (0x6), region = 85 }
 0x150   :  { %348 = vsyncpa [#allocation3], 1 }
 0x151   :  { %350 = vsyncpa [#allocation3 + $0x1], 1 }
 0x152   :  { %351 = vsyncpa [#allocation6], 1 }
 0x153   :  { %352 = vsyncpa [#allocation4], 1 }
 0x154   :  { %354 = vsyncpa [#allocation4 + $0x1], 1 }

</bundles_post_ra>
